<compile_context>
chip_gen: v6e
topology: v6e:2x2x1
jax: 0.10.0
libtpu: 0.0.40
codegen_flags: <defaults>
</compile_context>

<pallas_src>
import math
from functools import partial

import jax
import jax.numpy as jnp
from jax.experimental import pallas as pl
from jax.experimental.pallas import tpu as pltpu


def _copy_kernel(x_ref, o_ref):
    # Identity copy of the current (tile_rows, L) block.
    o_ref[...] = x_ref[...]


_LANE = 128
_SUBLANE = 8
_MAX_BLOCK_BYTES = 4 << 20   # ~4 MiB per block; 4x residency ~16 MiB.


def _choose_slab(total, itemsize):
    """Pick a dense (R, L) re-layout of `total` contiguous elements plus a row
    tile `tr` so blocks are lane/sublane dense and sized in the MiB range.

    Returns (R, L, tr) or None if `total` is not a multiple of 128."""
    best = None
    for lane_mult in (16, 8, 4, 2, 1):          # L = 2048, 1024, 512, 256, 128
        lanes = lane_mult * _LANE
        if total % lanes:
            continue
        rows = total // lanes
        if best is None:
            best = (rows, lanes)
        if rows % _SUBLANE == 0:                # prefer sublane-full layouts
            best = (rows, lanes)
            break
    if best is None:
        return None
    rows, lanes = best
    # Row tile: largest multiple of 8 dividing `rows` that fits the budget.
    max_rows = max(_MAX_BLOCK_BYTES // (lanes * itemsize), 1)
    tr = None
    r = (min(rows, max_rows) // _SUBLANE) * _SUBLANE
    while r >= _SUBLANE:
        if rows % r == 0:
            tr = r
            break
        r -= _SUBLANE
    if tr is None:
        tr = rows                               # full extent (always legal)
    return rows, lanes, tr


@partial(jax.jit, static_argnames=("ndims",))
def unflatten(x, ndims):
    """Pallas equivalent of Unflatten(ndims).forward(x): (B, ...) -> (B, *ndims)."""
    b = x.shape[0]
    flat = math.prod(ndims)
    trailing = math.prod(x.shape[1:]) if x.ndim > 1 else 1
    if trailing != flat:
        raise ValueError(f"cannot view {x.shape} as (batch, {ndims})")
    out_shape = (b, *ndims)
    total = b * flat
    itemsize = jnp.dtype(x.dtype).itemsize

    slab = _choose_slab(total, itemsize)

    if slab is None:
        # Trailing size not a multiple of 128: single full-extent block copy.
        x2d = jnp.reshape(x, (b, flat))
        out2d = pl.pallas_call(
            _copy_kernel,
            out_shape=jax.ShapeDtypeStruct((b, flat), x.dtype),
            in_specs=[pl.BlockSpec((b, flat), lambda: (0, 0))],
            out_specs=pl.BlockSpec((b, flat), lambda: (0, 0)),
            input_output_aliases={0: 0},
        )(x2d)
        return jnp.reshape(out2d, out_shape)

    rows, lanes, tr = slab
    # Row-major flatten + re-view as a dense slab (metadata only, matches
    # torch's contiguous .view element order exactly).
    xs = jnp.reshape(x, (rows, lanes))

    out = pl.pallas_call(
        _copy_kernel,
        out_shape=jax.ShapeDtypeStruct((rows, lanes), x.dtype),
        grid_spec=pltpu.PrefetchScalarGridSpec(
            num_scalar_prefetch=0,
            grid=(rows // tr,),
            in_specs=[pl.BlockSpec((tr, lanes), lambda i: (i, 0))],
            out_specs=pl.BlockSpec((tr, lanes), lambda i: (i, 0)),
        ),
        compiler_params=pltpu.CompilerParams(
            dimension_semantics=("parallel",),
            vmem_limit_bytes=48 << 20,
        ),
        input_output_aliases={0: 0},
    )(xs)
    return jnp.reshape(out, out_shape)


if __name__ == "__main__":
    key = jax.random.PRNGKey(0)

    # Typical use: a flattened feature map (B, C*H*W) unflattened to (B, C, H, W).
    B, C, H, W = 2, 4, 16, 16
    ndims = (C, H, W)
    x = jax.random.normal(key, (B, C * H * W), dtype=jnp.float32)

    y = jax.block_until_ready(unflatten(x, ndims))
    ref = jnp.reshape(x, (B, *ndims))
    assert y.shape == (B, C, H, W)
    assert y.dtype == x.dtype
    assert bool(jnp.array_equal(y, ref))

    # Also exercise the non-128-divisible fallback path.
    x2 = jax.random.normal(jax.random.PRNGKey(1), (2, 15), dtype=jnp.float32)
    y2 = jax.block_until_ready(unflatten(x2, (3, 5)))
    assert y2.shape == (2, 3, 5)
    assert bool(jnp.array_equal(y2, jnp.reshape(x2, (2, 3, 5))))

    print("KERNEL_OK")
</pallas_src>

<mosaic_0001>
module attributes {stable_mosaic.version = 11 : i64} {
  func.func @_copy_kernel(%arg0: i32, %arg1: memref<8x256xf32, #tpu.memory_space<vmem>>, %arg2: memref<8x256xf32, #tpu.memory_space<vmem>>) attributes {dimension_semantics = [#tpu.dimension_semantics<parallel>], iteration_bounds = array<i64: 1>, scalar_prefetch = 0 : i64, scratch_operands = 0 : i64, tpu.core_type = #tpu.core_type<tc>, window_params = [{transform_indices = @transform_0, window_bounds = array<i64: 8, 256>}, {transform_indices = @transform_1, window_bounds = array<i64: 8, 256>}]} {
    %c0 = arith.constant 0 : index
    %c0_0 = arith.constant 0 : index
    %0 = vector.load %arg1[%c0, %c0_0] : memref<8x256xf32, #tpu.memory_space<vmem>>, vector<8x256xf32>
    %c0_1 = arith.constant 0 : index
    %c0_2 = arith.constant 0 : index
    %1 = vector.load %arg2[%c0_1, %c0_2] : memref<8x256xf32, #tpu.memory_space<vmem>>, vector<8x256xf32>
    tpu.vector_store %arg2[%c0_1, %c0_2], %0 {strides = array<i32>} : memref<8x256xf32, #tpu.memory_space<vmem>>, vector<8x256xf32>,
    return
  }
  func.func @transform_0(%arg0: i32) -> (i32, i32) {
    %c0_i32 = arith.constant 0 : i32
    %c0_i32_0 = arith.constant 0 : i32
    return %arg0, %c0_i32 : i32, i32
  }
  func.func @transform_1(%arg0: i32) -> (i32, i32) {
    %c0_i32 = arith.constant 0 : i32
    %c0_i32_0 = arith.constant 0 : i32
    return %arg0, %c0_i32 : i32, i32
  }
}

</mosaic_0001>

<bundles_post_ra>
// kernel: unflatten.1
= control target key start
LH: loop header
LB: loop body
LE: loop exit
PB: predicated region body
PF: predicated region fallthrough
CT: control target
= control target key end

     0   :  { %s38_s0 = inlined_call_operand.vmem [shape: f32[8,256], index: 0, kind: input, shape index: {}, may-alias: {0,1}]   ;;  %s39_s1 = inlined_call_operand.vmem [shape: f32[8,256], index: 1, kind: output, shape index: {}, may-alias: {0,1}]  }
   0x1   :  { %v8_v0 = vld [vmem:[%s38_s0] sm:$0xff]  ;;  %v9_v1 = vld [vmem:[%s38_s0 + $0x8] sm:$0xff] }
   0x2   :  { %10 = vst [vmem:[%s39_s1] sm:$0xff] %v8_v0  ;;  %11 = vst [vmem:[%s39_s1 + $0x8] sm:$0xff] %v9_v1 }

</bundles_post_ra>
